<compile_context>
chip_gen: v6e
topology: v6e:2x2x1
jax: 0.10.0
libtpu: 0.0.40
codegen_flags: <defaults>
</compile_context>

<pallas_src>
import functools
import math

import jax
import jax.numpy as jnp
import numpy as np
from jax.experimental import pallas as pl
from jax.experimental.pallas import tpu as pltpu

LN_EPS = 1e-5          # nn.LayerNorm default eps
STAB = 1e-6            # numerical_stabilizer
TAU = 0.25
NUM_FEATS = 10         # m=10 hardcoded in TransConvLayer.create_projection_matrix(10, dim)
ALPHA = 0.5            # residual mixing
NEG_BIG = -1e30        # "minus infinity" for the running max (avoids inf arithmetic)

H_STORE_DTYPE = jnp.bfloat16           # inter-pass storage dtype of the hidden features
VMEM_LIMIT_BYTES = 48 * 1024 * 1024    # explicit scoped-VMEM limit (v5e default is only 16MiB)
TILE_BYTE_BUDGET = 12 * 1024 * 1024    # per-buffer row-stream budget used to size the node tile
ALIGN = 16                             # row-tile alignment (safe for bf16 sublane packing)


# ----------------------------- in-kernel helpers ---------------------------- #

def _layernorm(x, g, b):
    mu = jnp.mean(x, axis=-1, keepdims=True)
    var = jnp.mean(jnp.square(x - mu), axis=-1, keepdims=True)
    return (x - mu) * jax.lax.rsqrt(var + LN_EPS) * g + b


def _recip(x):
    # EUP reciprocal + one Newton step: heavy op goes to the EUP slot, accuracy
    # is restored to ~f32 so the validation tolerance stays tight.
    r = pl.reciprocal(x, approx=True)
    return r * (2.0 - x * r)


def _attn_block(h, wq_ext, bq_ext, kv, ksum, ln_g, ln_b, hdim, c2, ratio):
    # Performer attention for one row-tile.  wq_ext = [Wq | c*Wq@projt] so a
    # single matmul yields both q (for the diag term) and qp = c*q@projt.
    qext = jnp.dot(h, wq_ext, preferred_element_type=jnp.float32) + bq_ext
    q = qext[:, :hdim]
    qp = qext[:, hdim:]
    diag = (0.5 * c2) * jnp.sum(q * q, axis=-1, keepdims=True)
    qmax = jnp.max(qp, axis=-1, keepdims=True)
    qprime = ratio * (jnp.exp(qp - diag - qmax) + STAB)
    num = jnp.dot(qprime, kv, preferred_element_type=jnp.float32)
    den = jnp.sum(qprime * ksum, axis=-1, keepdims=True)
    attn = num * _recip(den)                       # single head -> head-mean is identity
    xmix = ALPHA * attn + (1.0 - ALPHA) * h        # residual uses the conv's own input
    return _layernorm(xmix, ln_g, ln_b)


def _reduce_init(kv_ref, ksum_ref, vsum_ref, mrun_ref):
    kv_ref[...] = jnp.zeros_like(kv_ref)
    ksum_ref[...] = jnp.zeros_like(ksum_ref)
    vsum_ref[...] = jnp.zeros_like(vsum_ref)
    mrun_ref[...] = jnp.full_like(mrun_ref, NEG_BIG)


def _reduce_accumulate(h, row_mask, wkv_ext, bkv_ext, hdim,
                       kv_ref, ksum_ref, vsum_ref, mrun_ref, c2):
    # Online-max accumulation of:
    #   kv_ref   <- sum_n exp(kp[n,:] - diag[n] - m_run) * v[n,:]^T      (M, H)
    #   ksum_ref <- sum_n exp(kp[n,:] - diag[n] - m_run)                 (1, M)
    #   vsum_ref <- sum_n v[n,:]                                         (1, H)
    # At the end m_run == global max(kp) == the reference key stabilizer.
    # wkv_ext = [Wk | Wv | c*Wk@projt] -> one matmul gives k (for diag), v, kp.
    kvext = jnp.dot(h, wkv_ext, preferred_element_type=jnp.float32) + bkv_ext
    k = kvext[:, :hdim]
    v = kvext[:, hdim:2 * hdim]
    kp = kvext[:, 2 * hdim:]

    # Mask garbage tail rows BEFORE any exp so inf/NaN can never leak in.
    kp = jnp.where(row_mask, kp, NEG_BIG)
    diag = jnp.where(row_mask, (0.5 * c2) * jnp.sum(k * k, axis=-1, keepdims=True), 0.0)
    v = jnp.where(row_mask, v, 0.0)

    tile_max = jnp.max(kp)
    m_old = mrun_ref[...]                      # (1, 1)
    m_new = jnp.maximum(m_old, tile_max)       # (1, 1)
    scale = jnp.exp(m_old - m_new)             # (1, 1)

    p = jnp.exp(kp - diag - m_new)             # (tn, M)
    p = jnp.where(row_mask, p, 0.0)

    kv_ref[...] = scale * kv_ref[...] + jax.lax.dot_general(
        p, v, (((0,), (0,)), ((), ())), preferred_element_type=jnp.float32)    # (M, H)
    ksum_ref[...] = scale * ksum_ref[...] + jnp.sum(p, axis=0, keepdims=True)  # (1, M)
    vsum_ref[...] = vsum_ref[...] + jnp.sum(v, axis=0, keepdims=True)          # (1, H)
    mrun_ref[...] = m_new


def _reduce_finalize(kv_ref, ksum_ref, vsum_ref, ratio, n_total):
    # Exact stabilizer fold-in:
    #   kprime = ratio * (exp(.) + STAB)  ==>
    #   kv   = ratio * (sum exp(.) v + STAB * sum v)
    #   ksum = ratio * (sum exp(.)   + STAB * N)
    kv_ref[...] = ratio * (kv_ref[...] + STAB * vsum_ref[...])
    ksum_ref[...] = ratio * (ksum_ref[...] + STAB * float(n_total))


# ----------------------------- kernels ------------------------------------- #

def mlp_reduce_kernel(x_ref, w0_ref, b0_ref, g0_ref, beta0_ref,
                      wkv_ref, bkv_ref,
                      h_ref, kv_ref, ksum_ref,
                      vsum_ref, mrun_ref,
                      *, hdim, c2, ratio, n_total, tn):
    # fcs[0] + bns[0] + ReLU, then accumulate layer-0 key/value statistics.
    i = pl.program_id(0)

    @pl.when(i == 0)
    def _():
        _reduce_init(kv_ref, ksum_ref, vsum_ref, mrun_ref)

    h = jnp.dot(x_ref[...], w0_ref[...], preferred_element_type=jnp.float32) + b0_ref[...]
    h = jnp.maximum(_layernorm(h, g0_ref[...], beta0_ref[...]), 0.0)
    h_store = h.astype(h_ref.dtype)
    h_ref[...] = h_store
    h = h_store.astype(jnp.float32)    # K-side sees exactly what the next pass will read

    rows = i * tn + jax.lax.broadcasted_iota(jnp.int32, (tn, 1), 0)
    row_mask = rows < n_total
    _reduce_accumulate(h, row_mask, wkv_ref[...], bkv_ref[...], hdim,
                       kv_ref, ksum_ref, vsum_ref, mrun_ref, c2)

    @pl.when(i == pl.num_programs(0) - 1)
    def _():
        _reduce_finalize(kv_ref, ksum_ref, vsum_ref, ratio, n_total)


def attn_reduce_kernel(x_ref, wq_ref, bq_ref, kvin_ref, ksumin_ref,
                       g_ref, beta_ref, wkv_ref, bkv_ref,
                       h_ref, kv_ref, ksum_ref,
                       vsum_ref, mrun_ref,
                       *, hdim, c2, ratio, n_total, tn):
    # attention output of layer i (residual + LayerNorm), fused with the
    # key/value reduction of layer i+1 over the freshly produced features.
    i = pl.program_id(0)

    @pl.when(i == 0)
    def _():
        _reduce_init(kv_ref, ksum_ref, vsum_ref, mrun_ref)

    h_in = x_ref[...].astype(jnp.float32)      # bf16 storage -> f32 math (v5e-safe)
    h_new = _attn_block(h_in, wq_ref[...], bq_ref[...], kvin_ref[...], ksumin_ref[...],
                        g_ref[...], beta_ref[...], hdim, c2, ratio)
    h_store = h_new.astype(h_ref.dtype)
    h_ref[...] = h_store
    h_new = h_store.astype(jnp.float32)

    rows = i * tn + jax.lax.broadcasted_iota(jnp.int32, (tn, 1), 0)
    row_mask = rows < n_total
    _reduce_accumulate(h_new, row_mask, wkv_ref[...], bkv_ref[...], hdim,
                       kv_ref, ksum_ref, vsum_ref, mrun_ref, c2)

    @pl.when(i == pl.num_programs(0) - 1)
    def _():
        _reduce_finalize(kv_ref, ksum_ref, vsum_ref, ratio, n_total)


def attn_fc_kernel(x_ref, wq_ref, bq_ref, kv_ref, ksum_ref,
                   g_ref, beta_ref, fcw_ref, fcb_ref, o_ref, *, hdim, c2, ratio):
    # attention output of the last layer fused with the final fc.
    h_in = x_ref[...].astype(jnp.float32)
    h_new = _attn_block(h_in, wq_ref[...], bq_ref[...], kv_ref[...], ksum_ref[...],
                        g_ref[...], beta_ref[...], hdim, c2, ratio)
    o_ref[...] = jnp.dot(h_new, fcw_ref[...],
                         preferred_element_type=jnp.float32) + fcb_ref[...]


# --------------------------- pallas_call wrappers --------------------------- #

def _row_spec(tn, width):
    return pl.BlockSpec((tn, width), lambda i: (i, 0))


def _full_spec(shape):
    return pl.BlockSpec(shape, lambda i: tuple(0 for _ in shape))


def mlp_reduce(x, w0, b0, g0, beta0, wkv_ext, bkv_ext, c2, ratio, tn):
    n, cin = x.shape
    hdim = w0.shape[1]
    m = wkv_ext.shape[1] - 2 * hdim
    kvw = wkv_ext.shape[1]
    return pl.pallas_call(
        functools.partial(mlp_reduce_kernel, hdim=hdim, c2=c2, ratio=ratio,
                          n_total=n, tn=tn),
        out_shape=(jax.ShapeDtypeStruct((n, hdim), H_STORE_DTYPE),
                   jax.ShapeDtypeStruct((m, hdim), jnp.float32),
                   jax.ShapeDtypeStruct((1, m), jnp.float32)),
        grid=(pl.cdiv(n, tn),),
        in_specs=[_row_spec(tn, cin),
                  _full_spec((cin, hdim)), _full_spec((1, hdim)),
                  _full_spec((1, hdim)), _full_spec((1, hdim)),
                  _full_spec((hdim, kvw)), _full_spec((1, kvw))],
        out_specs=(_row_spec(tn, hdim), _full_spec((m, hdim)), _full_spec((1, m))),
        scratch_shapes=[pltpu.VMEM((1, hdim), jnp.float32),
                        pltpu.VMEM((1, 1), jnp.float32)],
        compiler_params=pltpu.CompilerParams(
            dimension_semantics=("arbitrary",),
            vmem_limit_bytes=VMEM_LIMIT_BYTES),
    )(x, w0, b0, g0, beta0, wkv_ext, bkv_ext)


def attn_reduce(x, wq_ext, bq_ext, kv_in, ksum_in, g, beta,
                wkv_ext, bkv_ext, c2, ratio, tn):
    n, hdim = x.shape
    qw = wq_ext.shape[1]
    kvw = wkv_ext.shape[1]
    m = ksum_in.shape[1]
    return pl.pallas_call(
        functools.partial(attn_reduce_kernel, hdim=hdim, c2=c2, ratio=ratio,
                          n_total=n, tn=tn),
        out_shape=(jax.ShapeDtypeStruct((n, hdim), H_STORE_DTYPE),
                   jax.ShapeDtypeStruct((m, hdim), jnp.float32),
                   jax.ShapeDtypeStruct((1, m), jnp.float32)),
        grid=(pl.cdiv(n, tn),),
        in_specs=[_row_spec(tn, hdim),
                  _full_spec((hdim, qw)), _full_spec((1, qw)),
                  _full_spec((m, hdim)), _full_spec((1, m)),
                  _full_spec((1, hdim)), _full_spec((1, hdim)),
                  _full_spec((hdim, kvw)), _full_spec((1, kvw))],
        out_specs=(_row_spec(tn, hdim), _full_spec((m, hdim)), _full_spec((1, m))),
        scratch_shapes=[pltpu.VMEM((1, hdim), jnp.float32),
                        pltpu.VMEM((1, 1), jnp.float32)],
        compiler_params=pltpu.CompilerParams(
            dimension_semantics=("arbitrary",),
            vmem_limit_bytes=VMEM_LIMIT_BYTES),
    )(x, wq_ext, bq_ext, kv_in, ksum_in, g, beta, wkv_ext, bkv_ext)


def attn_fc(x, wq_ext, bq_ext, kv, ksum, g, beta, fcw, fcb, c2, ratio, tn):
    n, hdim = x.shape
    qw = wq_ext.shape[1]
    m = ksum.shape[1]
    out_ch = fcw.shape[1]
    return pl.pallas_call(
        functools.partial(attn_fc_kernel, hdim=hdim, c2=c2, ratio=ratio),
        out_shape=jax.ShapeDtypeStruct((n, out_ch), jnp.float32),
        grid=(pl.cdiv(n, tn),),
        in_specs=[_row_spec(tn, hdim),
                  _full_spec((hdim, qw)), _full_spec((1, qw)),
                  _full_spec((m, hdim)), _full_spec((1, m)),
                  _full_spec((1, hdim)), _full_spec((1, hdim)),
                  _full_spec((hdim, out_ch)), _full_spec((1, out_ch))],
        out_specs=_row_spec(tn, out_ch),
        compiler_params=pltpu.CompilerParams(
            dimension_semantics=("parallel",),
            vmem_limit_bytes=VMEM_LIMIT_BYTES),
    )(x, wq_ext, bq_ext, kv, ksum, g, beta, fcw, fcb)


# ------------------------------ model glue ---------------------------------- #

def make_projection_matrix(m, d, key):
    """Deterministic analogue of create_projection_matrix(m, d, scaling=0)."""
    k1, k2 = jax.random.split(key)
    nb_full = m // d
    keys = jax.random.split(k1, nb_full + 1)
    blocks = []
    for i in range(nb_full):
        q, _ = jnp.linalg.qr(jax.random.normal(keys[i], (d, d), jnp.float32))
        blocks.append(q.T)
    rem = m - nb_full * d
    if rem > 0:
        q, _ = jnp.linalg.qr(jax.random.normal(keys[nb_full], (d, d), jnp.float32))
        blocks.append(q.T[:rem])
    final = jnp.vstack(blocks)                                     # (m, d)
    multiplier = jnp.linalg.norm(jax.random.normal(k2, (m, d), jnp.float32), axis=1)
    return multiplier[:, None] * final                             # (m, d)


def init_params(key, in_ch, hidden, out_ch, num_layers):
    keys = jax.random.split(key, 2 + num_layers)

    def lin(k, fi, fo):
        kw, kb = jax.random.split(k)
        w = jax.random.normal(kw, (fi, fo), jnp.float32) / math.sqrt(fi)
        b = 0.01 * jax.random.normal(kb, (1, fo), jnp.float32)
        return w, b

    fc0_w, fc0_b = lin(keys[0], in_ch, hidden)
    fc_w, fc_b = lin(keys[1], hidden, out_ch)
    params = dict(fc0_w=fc0_w, fc0_b=fc0_b,
                  ln0_g=jnp.ones((1, hidden), jnp.float32),
                  ln0_b=jnp.zeros((1, hidden), jnp.float32),
                  fc_w=fc_w, fc_b=fc_b, layers=[])
    for i in range(num_layers):
        lk = jax.random.split(keys[2 + i], 4)
        wq, bq = lin(lk[0], hidden, hidden)   # num_heads=1 -> hidden*1
        wk, bk = lin(lk[1], hidden, hidden)
        wv, bv = lin(lk[2], hidden, hidden)
        proj = make_projection_matrix(NUM_FEATS, hidden, lk[3])     # (M, D)
        params['layers'].append(dict(
            wq=wq, bq=bq, wk=wk, bk=bk, wv=wv, bv=bv,
            projt=jnp.asarray(proj.T),                              # (D, M)
            ln_g=jnp.ones((1, hidden), jnp.float32),
            ln_b=jnp.zeros((1, hidden), jnp.float32)))
    return params


def _lane_pad(w):
    return ((w + 127) // 128) * 128


def sgformer_nf_forward(node_feat, params, tn=8192):
    n, in_ch = node_feat.shape
    hidden = params['fc0_w'].shape[1]
    out_ch = params['fc_w'].shape[1]

    # Size the node tile: as large as possible (amortize the ~0.35us/step
    # pipeline overhead) but bounded by a VMEM byte budget and by padded N.
    n_pad = ((n + ALIGN - 1) // ALIGN) * ALIGN
    row_bytes = (_lane_pad(in_ch) * 4 + 2 * _lane_pad(hidden) * 2 + _lane_pad(out_ch) * 4)
    budget_rows = max(ALIGN, (TILE_BYTE_BUDGET // row_bytes) // ALIGN * ALIGN)
    tn = max(ALIGN, (int(tn) // ALIGN) * ALIGN)
    tn = min(tn, n_pad, budget_rows)

    c = (1.0 / math.sqrt(TAU)) * (1.0 / math.sqrt(math.sqrt(hidden)))
    c2 = c * c
    ratio = 1.0 / math.sqrt(NUM_FEATS)
    layers = params['layers']

    # Fold the random-feature projection into the Q / K weights (wrapper side).
    def q_ext(layer):
        wq, bq, projt = layer['wq'], layer['bq'], layer['projt']
        return (jnp.concatenate([wq, c * (wq @ projt)], axis=1),
                jnp.concatenate([bq, c * (bq @ projt)], axis=1))

    def kv_ext(layer):
        wk, bk = layer['wk'], layer['bk']
        wv, bv = layer['wv'], layer['bv']
        projt = layer['projt']
        return (jnp.concatenate([wk, wv, c * (wk @ projt)], axis=1),
                jnp.concatenate([bk, bv, c * (bk @ projt)], axis=1))

    # pass 0: input MLP + layer-0 K/V reduce
    wkv, bkv = kv_ext(layers[0])
    h, kv, ksum = mlp_reduce(node_feat, params['fc0_w'], params['fc0_b'],
                             params['ln0_g'], params['ln0_b'],
                             wkv, bkv, c2, ratio, tn)

    # passes 1..L-1: attention of layer i fused with K/V reduce of layer i+1
    for i in range(len(layers) - 1):
        lyr, nxt = layers[i], layers[i + 1]
        wq, bq = q_ext(lyr)
        wkv, bkv = kv_ext(nxt)
        h, kv, ksum = attn_reduce(h, wq, bq, kv, ksum,
                                  lyr['ln_g'], lyr['ln_b'],
                                  wkv, bkv, c2, ratio, tn)

    # last pass: attention of the last layer + final fc
    # use_graph=False (gnn is None), aggregate='add' -> x = x1 ; out = fc(x)
    last = layers[-1]
    wq, bq = q_ext(last)
    return attn_fc(h, wq, bq, kv, ksum, last['ln_g'], last['ln_b'],
                   params['fc_w'], params['fc_b'], c2, ratio, tn)


def reference_forward(node_feat, params):
    """Plain-jnp reference of the same math (for validation).

    Uses HIGHEST-precision matmuls and mirrors the kernel's bf16 storage points
    of the hidden features, so the comparison isolates kernel correctness.
    """
    hp = jax.lax.Precision.HIGHEST

    def mm(a, b):
        return jnp.dot(a, b, precision=hp)

    def ln(x, g, b):
        mu = x.mean(-1, keepdims=True)
        var = ((x - mu) ** 2).mean(-1, keepdims=True)
        return (x - mu) / jnp.sqrt(var + LN_EPS) * g + b

    def store(x):  # inter-pass storage round-trip (same points as the kernels)
        return x.astype(H_STORE_DTYPE).astype(jnp.float32)

    x = jnp.maximum(ln(mm(node_feat, params['fc0_w']) + params['fc0_b'].ravel(),
                       params['ln0_g'].ravel(), params['ln0_b'].ravel()), 0.0)
    x = store(x)
    d = x.shape[1]
    c = (1.0 / math.sqrt(TAU)) * d ** (-0.25)
    ratio = 1.0 / math.sqrt(NUM_FEATS)
    n_layers = len(params['layers'])
    for li, layer in enumerate(params['layers']):
        projt = layer['projt']
        q = mm(x, layer['wq']) + layer['bq'].ravel()
        k = mm(x, layer['wk']) + layer['bk'].ravel()
        v = mm(x, layer['wv']) + layer['bv'].ravel()
        qn, kn = c * q, c * k
        qp, kp = mm(qn, projt), mm(kn, projt)
        dq = 0.5 * jnp.sum(qn * qn, -1, keepdims=True)
        dk = 0.5 * jnp.sum(kn * kn, -1, keepdims=True)
        qprime = ratio * (jnp.exp(qp - dq - qp.max(-1, keepdims=True)) + STAB)
        kprime = ratio * (jnp.exp(kp - dk - kp.max()) + STAB)
        num = mm(qprime, mm(kprime.T, v))
        den = mm(qprime, kprime.sum(0))
        attn = num / den[:, None]
        x = ln(ALPHA * attn + (1.0 - ALPHA) * x,
               layer['ln_g'].ravel(), layer['ln_b'].ravel())
        if li < n_layers - 1:
            x = store(x)
    return mm(x, params['fc_w']) + params['fc_b'].ravel()


if __name__ == "__main__":
    IN_CH, HIDDEN, OUT_CH, NUM_LAYERS = 16, 32, 8, 2

    key = jax.random.PRNGKey(0)
    kx1, kx2, kparams = jax.random.split(key, 3)
    params = init_params(kparams, IN_CH, HIDDEN, OUT_CH, NUM_LAYERS)

    # Case 1: N = 64 -> single tile after clamping.
    x1 = jax.random.normal(kx1, (64, IN_CH), jnp.float32)
    out1 = jax.block_until_ready(sgformer_nf_forward(x1, params))
    assert out1.shape == (64, OUT_CH)
    ref1 = reference_forward(x1, params)
    np.testing.assert_allclose(np.asarray(out1), np.asarray(ref1), rtol=5e-3, atol=5e-3)

    # Case 2: ragged N with a multi-tile online-max reduction (tail masking).
    x2 = jax.random.normal(kx2, (200, IN_CH), jnp.float32)
    out2 = jax.block_until_ready(sgformer_nf_forward(x2, params, tn=64))
    assert out2.shape == (200, OUT_CH)
    ref2 = reference_forward(x2, params)
    np.testing.assert_allclose(np.asarray(out2), np.asarray(ref2), rtol=5e-3, atol=5e-3)

    print("KERNEL_OK")
</pallas_src>

<mosaic_0001>
module attributes {stable_mosaic.version = 11 : i64} {
  func.func @mlp_reduce_kernel(%arg0: i32, %arg1: memref<64x16xf32, #tpu.memory_space<vmem>>, %arg2: memref<16x32xf32, #tpu.memory_space<vmem>>, %arg3: memref<1x32xf32, #tpu.memory_space<vmem>>, %arg4: memref<1x32xf32, #tpu.memory_space<vmem>>, %arg5: memref<1x32xf32, #tpu.memory_space<vmem>>, %arg6: memref<32x74xf32, #tpu.memory_space<vmem>>, %arg7: memref<1x74xf32, #tpu.memory_space<vmem>>, %arg8: memref<64x32xbf16, #tpu.memory_space<vmem>>, %arg9: memref<10x32xf32, #tpu.memory_space<vmem>>, %arg10: memref<1x10xf32, #tpu.memory_space<vmem>>, %arg11: memref<1x32xf32, #tpu.memory_space<vmem>>, %arg12: memref<1x1xf32, #tpu.memory_space<vmem>>) attributes {dimension_semantics = [#tpu.dimension_semantics<arbitrary>], iteration_bounds = array<i64: 1>, scalar_prefetch = 0 : i64, scratch_operands = 2 : i64, tpu.core_type = #tpu.core_type<tc>, window_params = [{transform_indices = @transform_0, window_bounds = array<i64: 64, 16>}, {pipeline_mode = #tpu.pipeline_mode<synchronous>, transform_indices = @transform_1, window_bounds = array<i64: 16, 32>}, {pipeline_mode = #tpu.pipeline_mode<synchronous>, transform_indices = @transform_2, window_bounds = array<i64: 1, 32>}, {pipeline_mode = #tpu.pipeline_mode<synchronous>, transform_indices = @transform_3, window_bounds = array<i64: 1, 32>}, {pipeline_mode = #tpu.pipeline_mode<synchronous>, transform_indices = @transform_4, window_bounds = array<i64: 1, 32>}, {pipeline_mode = #tpu.pipeline_mode<synchronous>, transform_indices = @transform_5, window_bounds = array<i64: 32, 74>}, {pipeline_mode = #tpu.pipeline_mode<synchronous>, transform_indices = @transform_6, window_bounds = array<i64: 1, 74>}, {transform_indices = @transform_7, window_bounds = array<i64: 64, 32>}, {pipeline_mode = #tpu.pipeline_mode<synchronous>, transform_indices = @transform_8, window_bounds = array<i64: 10, 32>}, {pipeline_mode = #tpu.pipeline_mode<synchronous>, transform_indices = @transform_9, window_bounds = array<i64: 1, 10>}]} {
    %c0_i32 = arith.constant 0 : i32
    %0 = arith.cmpi eq, %arg0, %c0_i32 : i32
    %1 = arith.extui %0 : i1 to i32
    %c0_i32_0 = arith.constant 0 : i32
    %2 = arith.cmpi ne, %1, %c0_i32_0 : i32
    scf.if %2 {
      %cst_52 = arith.constant 0.000000e+00 : f32
      %107 = vector.broadcast %cst_52 : f32 to vector<10x32xf32>
      %c0_53 = arith.constant 0 : index
      %c0_54 = arith.constant 0 : index
      %108 = vector.load %arg9[%c0_53, %c0_54] : memref<10x32xf32, #tpu.memory_space<vmem>>, vector<10x32xf32>
      tpu.vector_store %arg9[%c0_53, %c0_54], %107 {strides = array<i32>} : memref<10x32xf32, #tpu.memory_space<vmem>>, vector<10x32xf32>,
      %cst_55 = arith.constant 0.000000e+00 : f32
      %109 = vector.broadcast %cst_55 : f32 to vector<1x10xf32>
      %c0_56 = arith.constant 0 : index
      %c0_57 = arith.constant 0 : index
      %110 = vector.load %arg10[%c0_56, %c0_57] : memref<1x10xf32, #tpu.memory_space<vmem>>, vector<1x10xf32>
      tpu.vector_store %arg10[%c0_56, %c0_57], %109 {strides = array<i32>} : memref<1x10xf32, #tpu.memory_space<vmem>>, vector<1x10xf32>,
      %cst_58 = arith.constant 0.000000e+00 : f32
      %111 = vector.broadcast %cst_58 : f32 to vector<1x32xf32>
      %c0_59 = arith.constant 0 : index
      %c0_60 = arith.constant 0 : index
      %112 = vector.load %arg11[%c0_59, %c0_60] : memref<1x32xf32, #tpu.memory_space<vmem>>, vector<1x32xf32>
      tpu.vector_store %arg11[%c0_59, %c0_60], %111 {strides = array<i32>} : memref<1x32xf32, #tpu.memory_space<vmem>>, vector<1x32xf32>,
      %cst_61 = arith.constant -1.000000e+30 : f32
      %113 = vector.broadcast %cst_61 : f32 to vector<1x1xf32>
      %c0_62 = arith.constant 0 : index
      %c0_63 = arith.constant 0 : index
      %114 = vector.load %arg12[%c0_62, %c0_63] : memref<1x1xf32, #tpu.memory_space<vmem>>, vector<1x1xf32>
      tpu.vector_store %arg12[%c0_62, %c0_63], %113 {strides = array<i32>} : memref<1x1xf32, #tpu.memory_space<vmem>>, vector<1x1xf32>,
    } else {
    }
    %c0 = arith.constant 0 : index
    %c0_1 = arith.constant 0 : index
    %3 = vector.load %arg1[%c0, %c0_1] : memref<64x16xf32, #tpu.memory_space<vmem>>, vector<64x16xf32>
    %c0_2 = arith.constant 0 : index
    %c0_3 = arith.constant 0 : index
    %4 = vector.load %arg2[%c0_2, %c0_3] : memref<16x32xf32, #tpu.memory_space<vmem>>, vector<16x32xf32>
    %cst = arith.constant dense<0.000000e+00> : vector<64x32xf32>
    %5 = tpu.matmul %3, %4, %cst {dimension_numbers = #tpu.dot_dimension_numbers<[1], [0], [0], [1], [0, 0, 1, 1], [], []>} : vector<64x16xf32>, vector<16x32xf32>, vector<64x32xf32> -> vector<64x32xf32>
    %c0_4 = arith.constant 0 : index
    %c0_5 = arith.constant 0 : index
    %6 = vector.load %arg3[%c0_4, %c0_5] : memref<1x32xf32, #tpu.memory_space<vmem>>, vector<1x32xf32>
    %7 = vector.broadcast %6 : vector<1x32xf32> to vector<64x32xf32>
    %8 = arith.addf %5, %7 : vector<64x32xf32>
    %c0_6 = arith.constant 0 : index
    %c0_7 = arith.constant 0 : index
    %9 = vector.load %arg4[%c0_6, %c0_7] : memref<1x32xf32, #tpu.memory_space<vmem>>, vector<1x32xf32>
    %c0_8 = arith.constant 0 : index
    %c0_9 = arith.constant 0 : index
    %10 = vector.load %arg5[%c0_8, %c0_9] : memref<1x32xf32, #tpu.memory_space<vmem>>, vector<1x32xf32>
    %cst_10 = arith.constant dense<0.000000e+00> : vector<64xf32>
    %11 = vector.multi_reduction <add>, %8, %cst_10 [1] : vector<64x32xf32> to vector<64xf32>
    %12 = vector.shape_cast %11 : vector<64xf32> to vector<64x1xf32>
    %cst_11 = arith.constant 3.200000e+01 : f32
    %13 = vector.broadcast %cst_11 : f32 to vector<64x1xf32>
    %14 = arith.divf %12, %13 : vector<64x1xf32>
    %15 = vector.broadcast %14 : vector<64x1xf32> to vector<64x32xf32>
    %16 = arith.subf %8, %15 : vector<64x32xf32>
    %17 = arith.mulf %16, %16 : vector<64x32xf32>
    %cst_12 = arith.constant dense<0.000000e+00> : vector<64xf32>
    %18 = vector.multi_reduction <add>, %17, %cst_12 [1] : vector<64x32xf32> to vector<64xf32>
    %19 = vector.shape_cast %18 : vector<64xf32> to vector<64x1xf32>
    %cst_13 = arith.constant 3.200000e+01 : f32
    %20 = vector.broadcast %cst_13 : f32 to vector<64x1xf32>
    %21 = arith.divf %19, %20 : vector<64x1xf32>
    %22 = vector.broadcast %14 : vector<64x1xf32> to vector<64x32xf32>
    %23 = arith.subf %8, %22 : vector<64x32xf32>
    %cst_14 = arith.constant 9.99999974E-6 : f32
    %24 = vector.broadcast %cst_14 : f32 to vector<64x1xf32>
    %25 = arith.addf %21, %24 : vector<64x1xf32>
    %26 = math.rsqrt %25 : vector<64x1xf32>
    %27 = vector.broadcast %26 : vector<64x1xf32> to vector<64x32xf32>
    %28 = arith.mulf %23, %27 : vector<64x32xf32>
    %29 = vector.broadcast %9 : vector<1x32xf32> to vector<64x32xf32>
    %30 = arith.mulf %28, %29 : vector<64x32xf32>
    %31 = vector.broadcast %10 : vector<1x32xf32> to vector<64x32xf32>
    %32 = arith.addf %30, %31 : vector<64x32xf32>
    %cst_15 = arith.constant 0.000000e+00 : f32
    %33 = vector.broadcast %cst_15 : f32 to vector<64x32xf32>
    %34 = arith.maximumf %32, %33 : vector<64x32xf32>
    %35 = arith.truncf %34 : vector<64x32xf32> to vector<64x32xbf16>
    %c0_16 = arith.constant 0 : index
    %c0_17 = arith.constant 0 : index
    %36 = vector.load %arg8[%c0_16, %c0_17] : memref<64x32xbf16, #tpu.memory_space<vmem>>, vector<64x32xbf16>
    tpu.vector_store %arg8[%c0_16, %c0_17], %35 {strides = array<i32>} : memref<64x32xbf16, #tpu.memory_space<vmem>>, vector<64x32xbf16>,
    %37 = arith.extf %35 : vector<64x32xbf16> to vector<64x32xf32>
    %c64_i32 = arith.constant 64 : i32
    %38 = arith.muli %arg0, %c64_i32 : i32
    %39 = tpu.iota {dimensions = array<i32: 0>} : vector<64x1xi32>
    %40 = vector.broadcast %38 : i32 to vector<64x1xi32>
    %41 = arith.addi %40, %39 : vector<64x1xi32>
    %c64_i32_18 = arith.constant 64 : i32
    %42 = vector.broadcast %c64_i32_18 : i32 to vector<64x1xi32>
    %43 = arith.cmpi slt, %41, %42 : vector<64x1xi32>
    %c0_19 = arith.constant 0 : index
    %c0_20 = arith.constant 0 : index
    %44 = vector.load %arg6[%c0_19, %c0_20] : memref<32x74xf32, #tpu.memory_space<vmem>>, vector<32x74xf32>
    %c0_21 = arith.constant 0 : index
    %c0_22 = arith.constant 0 : index
    %45 = vector.load %arg7[%c0_21, %c0_22] : memref<1x74xf32, #tpu.memory_space<vmem>>, vector<1x74xf32>
    %cst_23 = arith.constant dense<0.000000e+00> : vector<64x74xf32>
    %46 = tpu.matmul %37, %44, %cst_23 {dimension_numbers = #tpu.dot_dimension_numbers<[1], [0], [0], [1], [0, 0, 1, 1], [], []>} : vector<64x32xf32>, vector<32x74xf32>, vector<64x74xf32> -> vector<64x74xf32>
    %47 = vector.broadcast %45 : vector<1x74xf32> to vector<64x74xf32>
    %48 = arith.addf %46, %47 : vector<64x74xf32>
    %49 = vector.extract_strided_slice %48 {offsets = [0, 0], sizes = [64, 32], strides = [1, 1]} : vector<64x74xf32> to vector<64x32xf32>
    %50 = vector.extract_strided_slice %48 {offsets = [0, 32], sizes = [64, 32], strides = [1, 1]} : vector<64x74xf32> to vector<64x32xf32>
    %51 = vector.extract_strided_slice %48 {offsets = [0, 64], sizes = [64, 10], strides = [1, 1]} : vector<64x74xf32> to vector<64x10xf32>
    %cst_24 = arith.constant -1.000000e+30 : f32
    %52 = vector.shape_cast %43 : vector<64x1xi1> to vector<64x1xi1>
    %53 = vector.broadcast %52 : vector<64x1xi1> to vector<64x10xi1>
    %54 = vector.broadcast %cst_24 : f32 to vector<64x10xf32>
    %55 = arith.select %53, %51, %54 : vector<64x10xi1>, vector<64x10xf32>
    %56 = arith.mulf %49, %49 : vector<64x32xf32>
    %cst_25 = arith.constant dense<0.000000e+00> : vector<64xf32>
    %57 = vector.multi_reduction <add>, %56, %cst_25 [1] : vector<64x32xf32> to vector<64xf32>
    %58 = vector.shape_cast %57 : vector<64xf32> to vector<64x1xf32>
    %cst_26 = arith.constant 0.353553385 : f32
    %59 = vector.broadcast %cst_26 : f32 to vector<64x1xf32>
    %60 = arith.mulf %59, %58 : vector<64x1xf32>
    %cst_27 = arith.constant 0.000000e+00 : f32
    %61 = vector.broadcast %cst_27 : f32 to vector<64x1xf32>
    %62 = arith.select %43, %60, %61 : vector<64x1xi1>, vector<64x1xf32>
    %cst_28 = arith.constant 0.000000e+00 : f32
    %63 = vector.shape_cast %43 : vector<64x1xi1> to vector<64x1xi1>
    %64 = vector.broadcast %63 : vector<64x1xi1> to vector<64x32xi1>
    %65 = vector.broadcast %cst_28 : f32 to vector<64x32xf32>
    %66 = arith.select %64, %50, %65 : vector<64x32xi1>, vector<64x32xf32>
    %67 = vector.shape_cast %55 : vector<64x10xf32> to vector<1x64x10xf32>
    %cst_29 = arith.constant dense<0xFF800000> : vector<1xf32>
    %68 = vector.multi_reduction <maximumf>, %67, %cst_29 [1, 2] : vector<1x64x10xf32> to vector<1xf32>
    %69 = vector.shape_cast %68 : vector<1xf32> to vector<1x1x1xf32>
    %70 = vector.extract %69[0, 0, 0] : f32 from vector<1x1x1xf32>
    %c0_30 = arith.constant 0 : index
    %c0_31 = arith.constant 0 : index
    %71 = vector.load %arg12[%c0_30, %c0_31] : memref<1x1xf32, #tpu.memory_space<vmem>>, vector<1x1xf32>
    %72 = vector.broadcast %70 : f32 to vector<1x1xf32>
    %73 = arith.maximumf %71, %72 : vector<1x1xf32>
    %74 = arith.subf %71, %73 : vector<1x1xf32>
    %75 = math.exp %74 : vector<1x1xf32>
    %76 = vector.broadcast %62 : vector<64x1xf32> to vector<64x10xf32>
    %77 = arith.subf %55, %76 : vector<64x10xf32>
    %78 = vector.broadcast %73 : vector<1x1xf32> to vector<64x10xf32>
    %79 = arith.subf %77, %78 : vector<64x10xf32>
    %80 = math.exp %79 : vector<64x10xf32>
    %cst_32 = arith.constant 0.000000e+00 : f32
    %81 = vector.shape_cast %43 : vector<64x1xi1> to vector<64x1xi1>
    %82 = vector.broadcast %81 : vector<64x1xi1> to vector<64x10xi1>
    %83 = vector.broadcast %cst_32 : f32 to vector<64x10xf32>
    %84 = arith.select %82, %80, %83 : vector<64x10xi1>, vector<64x10xf32>
    %c0_33 = arith.constant 0 : index
    %c0_34 = arith.constant 0 : index
    %85 = vector.load %arg9[%c0_33, %c0_34] : memref<10x32xf32, #tpu.memory_space<vmem>>, vector<10x32xf32>
    %86 = vector.broadcast %75 : vector<1x1xf32> to vector<10x32xf32>
    %87 = arith.mulf %86, %85 : vector<10x32xf32>
    %cst_35 = arith.constant dense<0.000000e+00> : vector<10x32xf32>
    %88 = tpu.matmul %84, %66, %cst_35 {dimension_numbers = #tpu.dot_dimension_numbers<[0], [0], [1], [1], [0, 1, 1, 1], [], []>} : vector<64x10xf32>, vector<64x32xf32>, vector<10x32xf32> -> vector<10x32xf32>
    %89 = arith.addf %87, %88 : vector<10x32xf32>
    %c0_36 = arith.constant 0 : index
    %c0_37 = arith.constant 0 : index
    %90 = vector.load %arg9[%c0_36, %c0_37] : memref<10x32xf32, #tpu.memory_space<vmem>>, vector<10x32xf32>
    tpu.vector_store %arg9[%c0_36, %c0_37], %89 {strides = array<i32>} : memref<10x32xf32, #tpu.memory_space<vmem>>, vector<10x32xf32>,
    %c0_38 = arith.constant 0 : index
    %c0_39 = arith.constant 0 : index
    %91 = vector.load %arg10[%c0_38, %c0_39] : memref<1x10xf32, #tpu.memory_space<vmem>>, vector<1x10xf32>
    %92 = vector.broadcast %75 : vector<1x1xf32> to vector<1x10xf32>
    %93 = arith.mulf %92, %91 : vector<1x10xf32>
    %cst_40 = arith.constant dense<0.000000e+00> : vector<10xf32>
    %94 = vector.multi_reduction <add>, %84, %cst_40 [0] : vector<64x10xf32> to vector<10xf32>
    %95 = vector.shape_cast %94 : vector<10xf32> to vector<1x10xf32>
    %96 = arith.addf %93, %95 : vector<1x10xf32>
    %c0_41 = arith.constant 0 : index
    %c0_42 = arith.constant 0 : index
    %97 = vector.load %arg10[%c0_41, %c0_42] : memref<1x10xf32, #tpu.memory_space<vmem>>, vector<1x10xf32>
    tpu.vector_store %arg10[%c0_41, %c0_42], %96 {strides = array<i32>} : memref<1x10xf32, #tpu.memory_space<vmem>>, vector<1x10xf32>,
    %c0_43 = arith.constant 0 : index
    %c0_44 = arith.constant 0 : index
    %98 = vector.load %arg11[%c0_43, %c0_44] : memref<1x32xf32, #tpu.memory_space<vmem>>, vector<1x32xf32>
    %cst_45 = arith.constant dense<0.000000e+00> : vector<32xf32>
    %99 = vector.multi_reduction <add>, %66, %cst_45 [0] : vector<64x32xf32> to vector<32xf32>
    %100 = vector.shape_cast %99 : vector<32xf32> to vector<1x32xf32>
    %101 = arith.addf %98, %100 : vector<1x32xf32>
    %c0_46 = arith.constant 0 : index
    %c0_47 = arith.constant 0 : index
    %102 = vector.load %arg11[%c0_46, %c0_47] : memref<1x32xf32, #tpu.memory_space<vmem>>, vector<1x32xf32>
    tpu.vector_store %arg11[%c0_46, %c0_47], %101 {strides = array<i32>} : memref<1x32xf32, #tpu.memory_space<vmem>>, vector<1x32xf32>,
    %c0_48 = arith.constant 0 : index
    %c0_49 = arith.constant 0 : index
    %103 = vector.load %arg12[%c0_48, %c0_49] : memref<1x1xf32, #tpu.memory_space<vmem>>, vector<1x1xf32>
    tpu.vector_store %arg12[%c0_48, %c0_49], %73 {strides = array<i32>} : memref<1x1xf32, #tpu.memory_space<vmem>>, vector<1x1xf32>,
    %c0_i32_50 = arith.constant 0 : i32
    %104 = arith.cmpi eq, %arg0, %c0_i32_50 : i32
    %105 = arith.extui %104 : i1 to i32
    %c0_i32_51 = arith.constant 0 : i32
    %106 = arith.cmpi ne, %105, %c0_i32_51 : i32
    scf.if %106 {
      %c0_52 = arith.constant 0 : index
      %c0_53 = arith.constant 0 : index
      %107 = vector.load %arg9[%c0_52, %c0_53] : memref<10x32xf32, #tpu.memory_space<vmem>>, vector<10x32xf32>
      %c0_54 = arith.constant 0 : index
      %c0_55 = arith.constant 0 : index
      %108 = vector.load %arg11[%c0_54, %c0_55] : memref<1x32xf32, #tpu.memory_space<vmem>>, vector<1x32xf32>
      %cst_56 = arith.constant 9.99999997E-7 : f32
      %109 = vector.broadcast %cst_56 : f32 to vector<1x32xf32>
      %110 = arith.mulf %109, %108 : vector<1x32xf32>
      %111 = vector.broadcast %110 : vector<1x32xf32> to vector<10x32xf32>
      %112 = arith.addf %107, %111 : vector<10x32xf32>
      %cst_57 = arith.constant 0.316227764 : f32
      %113 = vector.broadcast %cst_57 : f32 to vector<10x32xf32>
      %114 = arith.mulf %113, %112 : vector<10x32xf32>
      %c0_58 = arith.constant 0 : index
      %c0_59 = arith.constant 0 : index
      %115 = vector.load %arg9[%c0_58, %c0_59] : memref<10x32xf32, #tpu.memory_space<vmem>>, vector<10x32xf32>
      tpu.vector_store %arg9[%c0_58, %c0_59], %114 {strides = array<i32>} : memref<10x32xf32, #tpu.memory_space<vmem>>, vector<10x32xf32>,
      %c0_60 = arith.constant 0 : index
      %c0_61 = arith.constant 0 : index
      %116 = vector.load %arg10[%c0_60, %c0_61] : memref<1x10xf32, #tpu.memory_space<vmem>>, vector<1x10xf32>
      %cst_62 = arith.constant 6.400000e-05 : f32
      %117 = vector.broadcast %cst_62 : f32 to vector<1x10xf32>
      %118 = arith.addf %116, %117 : vector<1x10xf32>
      %cst_63 = arith.constant 0.316227764 : f32
      %119 = vector.broadcast %cst_63 : f32 to vector<1x10xf32>
      %120 = arith.mulf %119, %118 : vector<1x10xf32>
      %c0_64 = arith.constant 0 : index
      %c0_65 = arith.constant 0 : index
      %121 = vector.load %arg10[%c0_64, %c0_65] : memref<1x10xf32, #tpu.memory_space<vmem>>, vector<1x10xf32>
      tpu.vector_store %arg10[%c0_64, %c0_65], %120 {strides = array<i32>} : memref<1x10xf32, #tpu.memory_space<vmem>>, vector<1x10xf32>,
    } else {
    }
    return
  }
  func.func @transform_0(%arg0: i32) -> (i32, i32) {
    %c0_i32 = arith.constant 0 : i32
    %c0_i32_0 = arith.constant 0 : i32
    return %arg0, %c0_i32 : i32, i32
  }
  func.func @transform_1(%arg0: i32) -> (i32, i32) {
    %c0_i32 = arith.constant 0 : i32
    %c0_i32_0 = arith.constant 0 : i32
    %c0_i32_1 = arith.constant 0 : i32
    return %c0_i32, %c0_i32_0 : i32, i32
  }
  func.func @transform_2(%arg0: i32) -> (i32, i32) {
    %c0_i32 = arith.constant 0 : i32
    %c0_i32_0 = arith.constant 0 : i32
    %c0_i32_1 = arith.constant 0 : i32
    return %c0_i32, %c0_i32_0 : i32, i32
  }
  func.func @transform_3(%arg0: i32) -> (i32, i32) {
    %c0_i32 = arith.constant 0 : i32
    %c0_i32_0 = arith.constant 0 : i32
    %c0_i32_1 = arith.constant 0 : i32
    return %c0_i32, %c0_i32_0 : i32, i32
  }
  func.func @transform_4(%arg0: i32) -> (i32, i32) {
    %c0_i32 = arith.constant 0 : i32
    %c0_i32_0 = arith.constant 0 : i32
    %c0_i32_1 = arith.constant 0 : i32
    return %c0_i32, %c0_i32_0 : i32, i32
  }
  func.func @transform_5(%arg0: i32) -> (i32, i32) {
    %c0_i32 = arith.constant 0 : i32
    %c0_i32_0 = arith.constant 0 : i32
    %c0_i32_1 = arith.constant 0 : i32
    return %c0_i32, %c0_i32_0 : i32, i32
  }
  func.func @transform_6(%arg0: i32) -> (i32, i32) {
    %c0_i32 = arith.constant 0 : i32
    %c0_i32_0 = arith.constant 0 : i32
    %c0_i32_1 = arith.constant 0 : i32
    return %c0_i32, %c0_i32_0 : i32, i32
  }
  func.func @transform_7(%arg0: i32) -> (i32, i32) {
    %c0_i32 = arith.constant 0 : i32
    %c0_i32_0 = arith.constant 0 : i32
    return %arg0, %c0_i32 : i32, i32
  }
  func.func @transform_8(%arg0: i32) -> (i32, i32) {
    %c0_i32 = arith.constant 0 : i32
    %c0_i32_0 = arith.constant 0 : i32
    %c0_i32_1 = arith.constant 0 : i32
    return %c0_i32, %c0_i32_0 : i32, i32
  }
  func.func @transform_9(%arg0: i32) -> (i32, i32) {
    %c0_i32 = arith.constant 0 : i32
    %c0_i32_0 = arith.constant 0 : i32
    %c0_i32_1 = arith.constant 0 : i32
    return %c0_i32, %c0_i32_0 : i32, i32
  }
}

</mosaic_0001>

<bundles_post_ra>
// kernel: tpu_custom_call.1
= control target key start
LH: loop header
LB: loop body
LE: loop exit
PB: predicated region body
PF: predicated region fallthrough
CT: control target
= control target key end

     0   :  { %15 = vsyncpa [#allocation5], 0  ;;  %vm62_vm0 = vcmask 130048   ;;  %s1655_s0 = inlined_call_operand.vmem [shape: f32[64,16], index: 0, kind: input, shape index: {}]   ;;  %s1656_s1 = inlined_call_operand.vmem [shape: f32[16,32], index: 1, kind: input, shape index: {}]   ;;  %s1657_s2 = inlined_call_operand.vmem [shape: f32[1,32], index: 2, kind: input, shape index: {}]   ;;  %s1658_s3 = inlined_call_operand.vmem [shape: f32[1,32], index: 3, kind: input, shape index: {}]   ;;  %s1659_s4 = inlined_call_operand.vmem [shape: f32[1,32], index: 4, kind: input, shape index: {}]   ;;  %s1660_s5 = inlined_call_operand.vmem [shape: f32[32,74], index: 5, kind: input, shape index: {}]   ;;  %s1661_s6 = inlined_call_operand.vmem [shape: f32[1,74], index: 6, kind: input, shape index: {}]   ;;  %s1662_s7 = inlined_call_operand.vmem [shape: bf16[64,32], index: 7, kind: output, shape index: {0}]   ;;  %s1663_s8 = inlined_call_operand.hbm [shape: f32[10,32], index: 8, kind: output, shape index: {1}]   ;;  %s1664_s9 = inlined_call_operand.hbm [shape: f32[1,10], index: 9, kind: output, shape index: {2}]  }
   0x1   :  { %v54_v0 = vld [vmem:[%s1656_s1 + $0x8] sm:$0xff]  ;;  %v53_v1 = vld [vmem:[%s1656_s1] sm:$0xff]  ;;  %v47_v4 = vld [vmem:[%s1655_s0 + $0x10] sm:$0xff] }
   0x2   :  { %v45_v2 = vld [vmem:[%s1655_s0] sm:$0xff]  ;;  %1133 = vmatprep.subr.mxu0 %v54_v0  ;;  %v46_v3 = vld [vmem:[%s1655_s0 + $0x8] sm:$0xff] }
   0x3   :  { %1137 = vmatprep.mubr.msk.f32.mxu0 %vm62_vm0, %v45_v2  ;;  %1134 = vmatpush3.msra.mxu0 %v54_v0 }
   0x4   :  { %1135 = vmatprep.subr.mxu0 %v53_v1 }
   0x5   :  { %16 = vsyncpa [#allocation7], 0  ;;  %1136 = vmatpush3.msra.mxu0 %v53_v1  ;;  %v48_v5 = vld [vmem:[%s1655_s0 + $0x18] sm:$0xff]  ;;  %v49_v6 = vld [vmem:[%s1655_s0 + $0x20] sm:$0xff]  ;;  %vm35_vm1 = vcmask 261120   ;;  %vm368_vm2 = vcmask 257024  }
   0x6   :  { %1138 = vmatmul.mubr.msk.f32.vlgmr.msra.gmra.mxu0 %vm62_vm0, %v46_v3  ;;  %v50_v7 = vld [vmem:[%s1655_s0 + $0x28] sm:$0xff]  ;;  %v51_v8 = vld [vmem:[%s1655_s0 + $0x30] sm:$0xff]  ;;  %v52_v9 = vld [vmem:[%s1655_s0 + $0x38] sm:$0xff]  ;;  %vm632_vm3 = vcmask 605696   ;;  %vm43_vm4 = vcmask 0   ;;  %vm961_vm5 = vcmask 523520  }
   0x7   :  { %1140 = vmatprep.mubr.msk.f32.mxu0 %vm62_vm0, %v47_v4  ;;  %v1063_v11 = vld [vmem:[%s1657_s2] ss:$0 sm:$0xff]  ;;  %s1283_s10 = smov 96   ;;  %vm39_vm6 = vcmask 73728   ;;  %vm37_vm7 = vcmask 254976   ;;  %vm41_vm8 = vcmask 253952  }
   0x8   :  { %vm821_vm9 = vcmask 523264   ;;  %s1286_s11 = smov [#allocation6]  }
   0x9   :  { %s1049_s12 = sshll.u32 %s1286_s11, 4  ;;  %s1050_s12 = int_to_ptr.vmem [resolvable:$true] %s1049_s12 }
   0xa   :  { %1141 = vmatmul.mubr.msk.f32.gmra.mxu0 %vm62_vm0, %v48_v5  ;;  %s1236_s13 = scalar_lea.vmem %s1050_s12, 16  ;;  %s1240_s14 = scalar_lea.vmem %s1050_s12, 32 }
   0xb   :  { %1143 = vmatprep.mubr.msk.f32.mxu0 %vm62_vm0, %v49_v6  ;;  %p1237_p0 = scmp.ne.s32.totalorder %s1050_s12, %s1236_s13  ;;  %p1241_p1 = scmp.lt.s32.totalorder %s1050_s12, %s1050_s12 }
   0xc   :  { %p1242_p2 = scmp.lt.s32.totalorder %s1240_s14, %s1236_s13 }
   0xe   :  { %1144 = vmatmul.mubr.msk.f32.gmra.mxu0 %vm62_vm0, %v50_v7  ;;  %p1243_p3 = por %p1242_p2, %p1241_p1 }
   0xf   :  { %1146 = vmatprep.mubr.msk.f32.mxu0 %vm62_vm0, %v51_v8 }
  0x10   :  { %p1244_p4 = pnand %p1243_p3, %p1237_p0 }
  0x12   :  { %1147 = vmatmul.mubr.msk.f32.gmra.mxu0 %vm62_vm0, %v52_v9 }
  0xc6   :  { %v1139_v10 = vpop.f32.mrf.mxu0 }
  0xc7   :  { %v159_v15 = vadd.f32 %v1139_v10, %v1063_v11 }
  0xc8   :  { %v153_v12 = vpop.f32.mrf.mxu0 }
  0xc9   :  { %v154_v13 = vadd.f32 %v1063_v11, %v153_v12  ;;  %v198_v22 = vsel %vm35_vm1, %v159_v15, 0.0  ;;  %v414_v12 = vld [vmem:[%s1660_s5 + $0x10] sm:$0xff] }
  0xca   :  { %v1142_v14 = vpop.f32.mrf.mxu0 }
  0xcb   :  { %v195_v16 = vsel %vm35_vm1, %v154_v13, 0.0  ;;  %v169_v20 = vadd.f32 %v1142_v14, %v1063_v11  ;;  %v412_v14 = vld [vmem:[%s1660_s5] sm:$0xff] }
  0xcc   :  { %v163_v17 = vpop.f32.mrf.mxu0  ;;  %196 = vadd.xlane.f32.xlu0 %v195_v16 }
  0xcd   :  { %v164_v18 = vadd.f32 %v1063_v11, %v163_v17  ;;  %v204_v27 = vsel %vm35_vm1, %v169_v20, 0.0 }
  0xce   :  { %v1145_v19 = vpop.f32.mrf.mxu0 }
  0xcf   :  { %v201_v21 = vsel %vm35_vm1, %v164_v18, 0.0  ;;  %v179_v26 = vadd.f32 %v1145_v19, %v1063_v11 }
  0xd0   :  { %v173_v23 = vpop.f32.mrf.mxu0  ;;  %202 = vadd.xlane.f32.xlu1 %v201_v21  ;;  %199 = vadd.xlane.f32.xlu0 %v198_v22 }
  0xd1   :  { %v174_v24 = vadd.f32 %v1063_v11, %v173_v23  ;;  %v210_v32 = vsel %vm35_vm1, %v179_v26, 0.0 }
  0xd2   :  { %v1148_v25 = vpop.f32.mrf.mxu0 }
  0xd3   :  { %v207_v28 = vsel %vm35_vm1, %v174_v24, 0.0  ;;  %v189_v31 = vadd.f32 %v1148_v25, %v1063_v11 }
  0xd4   :  { %v183_v29 = vpop.f32.mrf.mxu0  ;;  %205 = vadd.xlane.f32.xlu1 %v204_v27  ;;  %208 = vadd.xlane.f32.xlu0 %v207_v28 }
  0xd5   :  { %v184_v30 = vadd.f32 %v1063_v11, %v183_v29  ;;  %v216_v34 = vsel %vm35_vm1, %v189_v31, 0.0  ;;  %v415_v11 = vld [vmem:[%s1660_s5 + $0x18] sm:$0xff] }
  0xd6   :  { %1149 = vmatprep.subr.mxu1 %v415_v11 }
  0xd7   :  { %v213_v33 = vsel %vm35_vm1, %v184_v30, 0.0  ;;  %1150 = vmatpush3.msra.mxu1 %v415_v11 }
  0xd8   :  { %211 = vadd.xlane.f32.xlu1 %v210_v32  ;;  %214 = vadd.xlane.f32.xlu0 %v213_v33 }
  0xd9   :  { %1151 = vmatprep.subr.mxu1 %v414_v12 }
  0xda   :  { %1152 = vmatpush3.msra.mxu1 %v414_v12 }
  0xdc   :  { %217 = vadd.xlane.f32.xlu1 %v216_v34 }
 0x155   :  { %v197_v35 = vpop.xlane.xlu0 %196 }
 0x156   :  { %v220_v36 = vmul.f32 0.03125, %v197_v35 }
 0x158   :  { %v1389_v37 = vsub.f32 %v154_v13, %v220_v36  ;;  %v413_v13 = vld [vmem:[%s1660_s5 + $0x8] sm:$0xff] }
 0x159   :  { %v203_v38 = vpop.xlane.xlu1 %202  ;;  %v200_v39 = vpop.xlane.xlu0 %199  ;;  %1153 = vmatprep.subr.mxu1 %v413_v13 }
 0x15a   :  { %v222_v40 = vmul.f32 0.03125, %v203_v38  ;;  %v221_v41 = vmul.f32 0.03125, %v200_v39  ;;  %v236_v42 = vmul.f32 %v1389_v37, %v1389_v37  ;;  %1154 = vmatpush3.msra.mxu1 %v413_v13 }
 0x15b   :  { %1155 = vmatprep.subr.mxu1 %v412_v14 }
 0x15c   :  { %v1393_v43 = vsub.f32 %v164_v18, %v222_v40  ;;  %v1395_v44 = vsub.f32 %v159_v15, %v221_v41  ;;  %v244_v45 = vsel %vm35_vm1, %v236_v42, 0.0  ;;  %1156 = vmatpush3.msra.mxu1 %v412_v14  ;;  %v1072_v40 = vld [vmem:[%s1658_s3] ss:$0 sm:$0xff] }
 0x15d   :  { %v206_v46 = vpop.xlane.xlu1 %205  ;;  %245 = vadd.xlane.f32.xlu0 %v244_v45  ;;  %v209_v47 = vpop.xlane.xlu0 %208  ;;  %v1073_v45 = vld [vmem:[%s1659_s4] ss:$0 sm:$0xff] }
 0x15e   :  { %v223_v48 = vmul.f32 0.03125, %v206_v46  ;;  %v224_v49 = vmul.f32 0.03125, %v209_v47  ;;  %v238_v50 = vmul.f32 %v1393_v43, %v1393_v43  ;;  %v237_v51 = vmul.f32 %v1395_v44, %v1395_v44 }
 0x160   :  { %v1402_v52 = vsub.f32 %v169_v20, %v223_v48  ;;  %v1404_v53 = vsub.f32 %v174_v24, %v224_v49  ;;  %v250_v54 = vsel %vm35_vm1, %v238_v50, 0.0  ;;  %v247_v55 = vsel %vm35_vm1, %v237_v51, 0.0 }
 0x161   :  { %v212_v56 = vpop.xlane.xlu1 %211  ;;  %251 = vadd.xlane.f32.xlu0 %v250_v54  ;;  %248 = vadd.xlane.f32.xlu1 %v247_v55  ;;  %v215_v57 = vpop.xlane.xlu0 %214 }
 0x162   :  { %v225_v58 = vmul.f32 0.03125, %v212_v56  ;;  %v226_v59 = vmul.f32 0.03125, %v215_v57  ;;  %v239_v60 = vmul.f32 %v1402_v52, %v1402_v52  ;;  %v240_v61 = vmul.f32 %v1404_v53, %v1404_v53 }
 0x164   :  { %v1412_v62 = vsub.f32 %v179_v26, %v225_v58  ;;  %v1414_v63 = vsub.f32 %v184_v30, %v226_v59  ;;  %v253_v0 = vsel %vm35_vm1, %v239_v60, 0.0  ;;  %v256_v1 = vsel %vm35_vm1, %v240_v61, 0.0 }
 0x165   :  { %v218_v2 = vpop.xlane.xlu1 %217  ;;  %254 = vadd.xlane.f32.xlu1 %v253_v0  ;;  %257 = vadd.xlane.f32.xlu0 %v256_v1 }
 0x166   :  { %v227_v3 = vmul.f32 0.03125, %v218_v2  ;;  %v241_v4 = vmul.f32 %v1412_v62, %v1412_v62  ;;  %v242_v5 = vmul.f32 %v1414_v63, %v1414_v63 }
 0x168   :  { %v1422_v6 = vsub.f32 %v189_v31, %v227_v3  ;;  %v259_v7 = vsel %vm35_vm1, %v241_v4, 0.0  ;;  %v262_v8 = vsel %vm35_vm1, %v242_v5, 0.0 }
 0x169   :  { %260 = vadd.xlane.f32.xlu1 %v259_v7  ;;  %263 = vadd.xlane.f32.xlu0 %v262_v8 }
 0x16a   :  { %v243_v9 = vmul.f32 %v1422_v6, %v1422_v6 }
 0x16c   :  { %v265_v10 = vsel %vm35_vm1, %v243_v9, 0.0 }
 0x16d   :  { %266 = vadd.xlane.f32.xlu1 %v265_v10 }
 0x1e6   :  { %v246_v15 = vpop.xlane.xlu0 %245 }
 0x1e7   :  { %v268_v16 = vmul.f32 0.03125, %v246_v15 }
 0x1e9   :  { %v276_v17 = vadd.f32 1e-05, %v268_v16 }
 0x1ea   :  { %v249_v18 = vpop.xlane.xlu1 %248  ;;  %v252_v19 = vpop.xlane.xlu0 %251 }
 0x1eb   :  { %1202 = vrsqrt.f32 %v276_v17  ;;  %v269_v20 = vmul.f32 0.03125, %v249_v18  ;;  %v270_v21 = vmul.f32 0.03125, %v252_v19 }
 0x1ed   :  { %v277_v22 = vadd.f32 1e-05, %v269_v20  ;;  %v278_v23 = vadd.f32 1e-05, %v270_v21 }
 0x1ee   :  { %v255_v24 = vpop.xlane.xlu1 %254  ;;  %v258_v25 = vpop.xlane.xlu0 %257 }
 0x1ef   :  { %1204 = vrsqrt.f32 %v277_v22  ;;  %v271_v26 = vmul.f32 0.03125, %v255_v24  ;;  %v272_v27 = vmul.f32 0.03125, %v258_v25 }
 0x1f0   :  { %1206 = vrsqrt.f32 %v278_v23 }
 0x1f1   :  { %v279_v28 = vadd.f32 1e-05, %v271_v26  ;;  %v280_v29 = vadd.f32 1e-05, %v272_v27  ;;  %v1082_v26 = vld [vmem:[%s1661_s6] ss:$0 sm:$0xff] }
 0x1f2   :  { %v261_v30 = vpop.xlane.xlu1 %260  ;;  %v264_v31 = vpop.xlane.xlu0 %263 }
 0x1f3   :  { %1208 = vrsqrt.f32 %v279_v28  ;;  %v273_v32 = vmul.f32 0.03125, %v261_v30  ;;  %v274_v33 = vmul.f32 0.03125, %v264_v31 }
 0x1f4   :  { %1210 = vrsqrt.f32 %v280_v29 }
 0x1f5   :  { %v281_v34 = vadd.f32 1e-05, %v273_v32  ;;  %v282_v35 = vadd.f32 1e-05, %v274_v33 }
 0x1f6   :  { %v267_v36 = vpop.xlane.xlu1 %266 }
 0x1f7   :  { %1212 = vrsqrt.f32 %v281_v34  ;;  %v275_v38 = vmul.f32 0.03125, %v267_v36 }
 0x1f8   :  { %v1203_v39 = vpop.eup %1202  ;;  %1214 = vrsqrt.f32 %v282_v35 }
 0x1f9   :  { %v283_v41 = vadd.f32 1e-05, %v275_v38  ;;  %v292_v42 = vmul.f32 %v1203_v39, %v1389_v37 }
 0x1fb   :  { %1216 = vrsqrt.f32 %v283_v41  ;;  %v306_v46 = vmul.f32 %v1072_v40, %v292_v42 }
 0x1fc   :  { %v1205_v47 = vpop.eup %1204 }
 0x1fd   :  { %v1207_v48 = vpop.eup %1206  ;;  %v320_v49 = vadd.f32 %v1073_v45, %v306_v46  ;;  %v293_v50 = vmul.f32 %v1205_v47, %v1395_v44 }
 0x1fe   :  { %v294_v51 = vmul.f32 %v1207_v48, %v1393_v43 }
 0x1ff   :  { %v328_v54 = vmax.f32 %v320_v49, 0.0  ;;  %v307_v55 = vmul.f32 %v1072_v40, %v293_v50 }
 0x200   :  { %v1209_v56 = vpop.eup %1208  ;;  %v308_v57 = vmul.f32 %v1072_v40, %v294_v51 }
 0x201   :  { %v1211_v58 = vpop.eup %1210  ;;  %v1093_v37 = vpack.c.bf16 %v328_v54, %v328_v54  ;;  %1157 = vmatprep.mubr.msk.f32.mxu1 %vm35_vm1, %v328_v54  ;;  %v321_v59 = vadd.f32 %v1073_v45, %v307_v55  ;;  %v295_v60 = vmul.f32 %v1209_v56, %v1402_v52 }
 0x202   :  { %v322_v61 = vadd.f32 %v1073_v45, %v308_v57  ;;  %v296_v0 = vmul.f32 %v1211_v58, %v1404_v53 }
 0x203   :  { %369 = vst.msk [vmem:[%s1662_s7] sm:$0xf] %vm368_vm2, %v1093_v37  ;;  %v329_v43 = vmax.f32 %v321_v59, 0.0  ;;  %v309_v44 = vmul.f32 %v1072_v40, %v295_v60 }
 0x204   :  { %v1213_v1 = vpop.eup %1212  ;;  %v330_v2 = vmax.f32 %v322_v61, 0.0  ;;  %v310_v3 = vmul.f32 %v1072_v40, %v296_v0 }
 0x205   :  { %v1215_v4 = vpop.eup %1214  ;;  %v1094_v5 = vpack.c.bf16 %v329_v43, %v329_v43  ;;  %1158 = vmatmul.mubr.msk.f32.vlgmr.msra.gmra.mxu1 %vm35_vm1, %v329_v43  ;;  %v323_v7 = vadd.f32 %v1073_v45, %v309_v44  ;;  %v297_v52 = vmul.f32 %v1213_v1, %v1412_v62 }
 0x206   :  { %v1095_v8 = vpack.c.bf16 %v330_v2, %v330_v2  ;;  %1160 = vmatprep.mubr.msk.f32.mxu1 %vm35_vm1, %v330_v2  ;;  %v324_v53 = vadd.f32 %v1073_v45, %v310_v3  ;;  %v298_v9 = vmul.f32 %v1215_v4, %v1414_v63 }
 0x207   :  { %370 = vst.msk [vmem:[%s1662_s7 + $0x4] sm:$0xf] %vm368_vm2, %v1094_v5  ;;  %v331_v10 = vmax.f32 %v323_v7, 0.0  ;;  %v311_v11 = vmul.f32 %v1072_v40, %v297_v52 }
 0x208   :  { %v1217_v12 = vpop.eup %1216  ;;  %371 = vst.msk [vmem:[%s1662_s7 + $0x8] sm:$0xf] %vm368_vm2, %v1095_v8  ;;  %v332_v62 = vmax.f32 %v324_v53, 0.0  ;;  %v312_v13 = vmul.f32 %v1072_v40, %v298_v9 }
 0x209   :  { %v1096_v14 = vpack.c.bf16 %v331_v10, %v331_v10  ;;  %1161 = vmatmul.mubr.msk.f32.gmra.mxu1 %vm35_vm1, %v331_v10  ;;  %v325_v15 = vadd.f32 %v1073_v45, %v311_v11  ;;  %v299_v63 = vmul.f32 %v1217_v12, %v1422_v6  ;;  %v1280_v12 = vmov -1e+30  }
 0x20a   :  { %v1097_v16 = vpack.c.bf16 %v332_v62, %v332_v62  ;;  %1163 = vmatprep.mubr.msk.f32.mxu1 %vm35_vm1, %v332_v62  ;;  %v326_v17 = vadd.f32 %v1073_v45, %v312_v13  ;;  %44 = vst.msk [vmem:[#allocation3] sm:$0x1] %vm43_vm4, %v1280_v12  ;;  %v1281_v62 = vmov 0  }
 0x20b   :  { %372 = vst.msk [vmem:[%s1662_s7 + $0xc] sm:$0xf] %vm368_vm2, %v1096_v14  ;;  %v333_v18 = vmax.f32 %v325_v15, 0.0  ;;  %v313_v19 = vmul.f32 %v1072_v40, %v299_v63  ;;  %1200 = vset.pattern.permute.xlu1 %v1281_v62 }
 0x20c   :  { %373 = vst.msk [vmem:[%s1662_s7 + $0x10] sm:$0xf] %vm368_vm2, %v1097_v16  ;;  %v334_v20 = vmax.f32 %v326_v17, 0.0 }
 0x20d   :  { %v1098_v21 = vpack.c.bf16 %v333_v18, %v333_v18  ;;  %1164 = vmatmul.mubr.msk.f32.gmra.mxu1 %vm35_vm1, %v333_v18  ;;  %v327_v6 = vadd.f32 %v1073_v45, %v313_v19  ;;  %v672_v19 = vlaneseq }
 0x20e   :  { %v1099_v22 = vpack.c.bf16 %v334_v20, %v334_v20  ;;  %1166 = vmatprep.mubr.msk.f32.mxu1 %vm35_vm1, %v334_v20 }
 0x20f   :  { %374 = vst.msk [vmem:[%s1662_s7 + $0x14] sm:$0xf] %vm368_vm2, %v1098_v21  ;;  %v335_v23 = vmax.f32 %v327_v6, 0.0  ;;  %v1556_v20 = vshrl.u32 %v672_v19, 7 }
 0x210   :  { %375 = vst.msk [vmem:[%s1662_s7 + $0x18] sm:$0xf] %vm368_vm2, %v1099_v22 }
 0x211   :  { %v1100_v24 = vpack.c.bf16 %v335_v23, %v335_v23  ;;  %1167 = vmatmul.mubr.msk.f32.gmra.mxu1 %vm35_vm1, %v335_v23  ;;  %v1558_v21 = vld [vmem:[#allocation3] sm:$0x1]  ;;  %v1561_v6 = vsub.s32 0, %v1556_v20 }
 0x213   :  { %376 = vst.msk [vmem:[%s1662_s7 + $0x1c] sm:$0xf] %vm368_vm2, %v1100_v24  ;;  %s1282_s7 = smov 64  }
 0x2c5   :  { %v1159_v25 = vpop.f32.mrf.mxu1 }
 0x2c6   :  { %v1512_v41 = vadd.f32 %v1159_v25, %v1082_v26 }
 0x2c7   :  { %v513_v27 = vpop.f32.mrf.mxu1 }
 0x2c8   :  { %v1498_v28 = vadd.f32 %v1082_v26, %v513_v27  ;;  %v634_v58 = vsel %vm632_vm3, %v1512_v41, -inf  ;;  %v577_v3 = vmul.f32 %v1512_v41, %v1512_v41  ;;  %v963_v12 = vsel %vm961_vm5, %v1512_v41, 0.0 }
 0x2c9   :  { %v1162_v29 = vpop.f32.mrf.mxu1 }
 0x2ca   :  { %v576_v30 = vmul.f32 %v1498_v28, %v1498_v28  ;;  %v1514_v45 = vadd.f32 %v1162_v29, %v1082_v26  ;;  %v633_v50 = vsel %vm632_vm3, %v1498_v28, -inf  ;;  %v587_v4 = vsel %vm35_vm1, %v577_v3, 0.0 }
 0x2cb   :  { %v523_v31 = vpop.f32.mrf.mxu1 }
 0x2cc   :  { %v1502_v32 = vadd.f32 %v1082_v26, %v523_v31  ;;  %v584_v33 = vsel %vm35_vm1, %v576_v30, 0.0  ;;  %v636_v59 = vsel %vm632_vm3, %v1514_v45, -inf  ;;  %v579_v5 = vmul.f32 %v1514_v45, %v1514_v45 }
 0x2cd   :  { %585 = vadd.xlane.f32.xlu1 %v584_v33  ;;  %v1165_v34 = vpop.f32.mrf.mxu1 }
 0x2ce   :  { %v578_v35 = vmul.f32 %v1502_v32, %v1502_v32  ;;  %v1507_v38 = vadd.f32 %v1165_v34, %v1082_v26  ;;  %v635_v37 = vsel %vm632_vm3, %v1502_v32, -inf  ;;  %v593_v7 = vsel %vm35_vm1, %v579_v5, 0.0 }
 0x2cf   :  { %v533_v36 = vpop.f32.mrf.mxu1 }
 0x2d0   :  { %v1509_v39 = vadd.f32 %v1082_v26, %v533_v36  ;;  %v590_v40 = vsel %vm35_vm1, %v578_v35, 0.0  ;;  %v639_v55 = vsel %vm632_vm3, %v1507_v38, -inf  ;;  %v581_v52 = vmul.f32 %v1507_v38, %v1507_v38 }
 0x2d1   :  { %591 = vadd.xlane.f32.xlu1 %v590_v40  ;;  %v1168_v42 = vpop.f32.mrf.mxu1  ;;  %v640_v61 = vmax.f32 %v634_v58, %v639_v55 }
 0x2d2   :  { %v1516_v46 = vadd.f32 %v1168_v42, %v1082_v26  ;;  %v580_v47 = vmul.f32 %v1509_v39, %v1509_v39  ;;  %v637_v48 = vsel %vm632_vm3, %v1509_v39, -inf  ;;  %v599_v8 = vsel %vm35_vm1, %v581_v52, 0.0 }
 0x2d3   :  { %v543_v49 = vpop.f32.mrf.mxu1  ;;  %v638_v57 = vmax.f32 %v633_v50, %v637_v48 }
 0x2d4   :  { %v1524_v51 = vadd.f32 %v1082_v26, %v543_v49  ;;  %v596_v54 = vsel %vm35_vm1, %v580_v47, 0.0  ;;  %v643_v56 = vsel %vm632_vm3, %v1516_v46, -inf  ;;  %v583_v10 = vmul.f32 %v1516_v46, %v1516_v46 }
 0x2d5   :  { %597 = vadd.xlane.f32.xlu1 %v596_v54  ;;  %v644_v43 = vmax.f32 %v636_v59, %v643_v56  ;;  %v645_v44 = vmax.f32 %v638_v57, %v640_v61 }
 0x2d6   :  { %v641_v60 = vsel %vm632_vm3, %v1524_v51, -inf  ;;  %v582_v53 = vmul.f32 %v1524_v51, %v1524_v51  ;;  %v605_v11 = vsel %vm35_vm1, %v583_v10, 0.0  ;;  %v962_v10 = vsel %vm961_vm5, %v1498_v28, 0.0 }
 0x2d7   :  { %v642_v0 = vmax.f32 %v635_v37, %v641_v60 }
 0x2d8   :  { %v602_v9 = vsel %vm35_vm1, %v582_v53, 0.0 }
 0x2d9   :  { %v646_v1 = vmax.f32 %v642_v0, %v644_v43 }
 0x2db   :  { %v647_v2 = vmax.f32 %v645_v44, %v646_v1 }
 0x2dd   :  { %648 = vmax.xlane.f32.xlu0 %v647_v2 }
 0x2e1   :  { %588 = vadd.xlane.f32.xlu0 %v587_v4 }
 0x2e5   :  { %594 = vadd.xlane.f32.xlu0 %v593_v7 }
 0x2e9   :  { %600 = vadd.xlane.f32.xlu0 %v599_v8 }
 0x2ed   :  { %603 = vadd.xlane.f32.xlu0 %v602_v9 }
 0x2f1   :  { %606 = vadd.xlane.f32.xlu0 %v605_v11 }
 0x356   :  { %v586_v27 = vpop.xlane.xlu1 %585 }
 0x357   :  { %v608_v35 = vmul.f32 0.35355338, %v586_v27 }
 0x359   :  { %v663_v50 = vsub.f32 %v1498_v28, %v608_v35 }
 0x35a   :  { %v592_v30 = vpop.xlane.xlu1 %591 }
 0x35b   :  { %v610_v36 = vmul.f32 0.35355338, %v592_v30 }
 0x35d   :  { %v665_v54 = vsub.f32 %v1502_v32, %v610_v36 }
 0x35e   :  { %v598_v33 = vpop.xlane.xlu1 %597 }
 0x35f   :  { %v612_v47 = vmul.f32 0.35355338, %v598_v33 }
 0x361   :  { %v667_v57 = vsub.f32 %v1509_v39, %v612_v47 }
 0x366   :  { %v649_v13 = vpop.xlane.xlu0 %648 }
 0x367   :  { %v650_v14 = vrot.slane %v649_v13, 4 }
 0x369   :  { %v651_v15 = vmax.f32 %v649_v13, %v650_v14  ;;  %v965_v13 = vsel %vm961_vm5, %v1502_v32, 0.0 }
 0x36a   :  { %v589_v26 = vpop.xlane.xlu0 %588 }
 0x36b   :  { %v652_v63 = vrot.slane %v651_v15, 2  ;;  %v609_v40 = vmul.f32 0.35355338, %v589_v26  ;;  %v969_v26 = vsel %vm961_vm5, %v1509_v39, 0.0 }
 0x36d   :  { %v653_v16 = vmax.f32 %v651_v15, %v652_v63  ;;  %v664_v55 = vsub.f32 %v1512_v41, %v609_v40  ;;  %v964_v15 = vadd.f32 %v963_v12, %v962_v10 }
 0x36e   :  { %v595_v29 = vpop.xlane.xlu0 %594 }
 0x36f   :  { %v654_v17 = vrot.slane %v653_v16, 1  ;;  %v611_v42 = vmul.f32 0.35355338, %v595_v29 }
 0x371   :  { %v655_v18 = vmax.f32 %v653_v16, %v654_v17  ;;  %v666_v56 = vsub.f32 %v1514_v45, %v611_v42  ;;  %v966_v16 = vadd.f32 %v965_v13, %v964_v15  ;;  %v967_v17 = vsel %vm961_vm5, %v1514_v45, 0.0 }
 0x372   :  { %v601_v31 = vpop.xlane.xlu0 %600 }
 0x373   :  { %1188 = vpush %v655_v18  ;;  %v613_v49 = vmul.f32 0.35355338, %v601_v31 }
 0x375   :  { %v668_v43 = vsub.f32 %v1507_v38, %v613_v49 }
 0x376   :  { %v604_v34 = vpop.xlane.xlu0 %603 }
 0x377   :  { %v614_v48 = vmul.f32 0.35355338, %v604_v34 }
 0x379   :  { %v669_v58 = vsub.f32 %v1524_v51, %v614_v48  ;;  %v971_v48 = vsel %vm961_vm5, %v1507_v38, 0.0 }
 0x37a   :  { %v607_v5 = vpop.xlane.xlu0 %606 }
 0x37b   :  { %v615_v53 = vmul.f32 0.35355338, %v607_v5 }
 0x37d   :  { %v670_v14 = vsub.f32 %v1516_v46, %v615_v53 }
 0x3a4   :  { %s1189_s6 = spop %1188 }
 0x3a5   :  { %v658_v22 = vstv %s1189_s6 }
 0x3a6   :  { %v1564_v23 = vmax.f32 %v1558_v21, %v658_v22  ;;  %v968_v22 = vadd.f32 %v967_v17, %v966_v16 }
 0x3a8   :  { %v660_v24 = vsub.f32 %v1558_v21, %v1564_v23  ;;  %1005 = vst.msk [vmem:[#allocation3] sm:$0x1] %vm43_vm4, %v1564_v23  ;;  %v675_v25 = vrot.slane %v1564_v23, %v1561_v6  ;;  %v970_v34 = vadd.f32 %v969_v26, %v968_v22 }
 0x3aa   :  { %677 = vperm.xlu1 %1200, %v675_v25  }
 0x425   :  { %v678_v37 = vpop.permute.xlu1 %677 }
 0x426   :  { %v680_v59 = vsub.f32 %v663_v50, %v678_v37  ;;  %v681_v60 = vsub.f32 %v664_v55, %v678_v37  ;;  %v682_v61 = vsub.f32 %v665_v54, %v678_v37  ;;  %v683_v0 = vsub.f32 %v666_v56, %v678_v37 }
 0x427   :  { %v684_v44 = vsub.f32 %v667_v57, %v678_v37  ;;  %v686_v1 = vsub.f32 %v669_v58, %v678_v37  ;;  %v685_v52 = vsub.f32 %v668_v43, %v678_v37  ;;  %v687_v63 = vsub.f32 %v670_v14, %v678_v37 }
 0x428   :  { %v688_v2 = vmul.f32 1.442695, %v680_v59  ;;  %v690_v3 = vmul.f32 1.442695, %v681_v60  ;;  %v692_v4 = vmul.f32 1.442695, %v682_v61  ;;  %v972_v54 = vadd.f32 %v971_v48, %v970_v34 }
 0x429   :  { %v694_v7 = vmul.f32 1.442695, %v683_v0  ;;  %v696_v8 = vmul.f32 1.442695, %v684_v44  ;;  %v700_v9 = vmul.f32 1.442695, %v686_v1 }
 0x42a   :  { %1218 = vpow2.f32 %v688_v2  ;;  %v698_v11 = vmul.f32 1.442695, %v685_v52  ;;  %v702_v18 = vmul.f32 1.442695, %v687_v63  ;;  %v973_v56 = vsel %vm961_vm5, %v1524_v51, 0.0 }
 0x42b   :  { %1220 = vpow2.f32 %v690_v3  ;;  %v974_v37 = vadd.f32 %v973_v56, %v972_v54  ;;  %v975_v60 = vsel %vm961_vm5, %v1516_v46, 0.0 }
 0x42c   :  { %1222 = vpow2.f32 %v692_v4 }
 0x42d   :  { %1224 = vpow2.f32 %v694_v7  ;;  %v976_v43 = vadd.f32 %v975_v60, %v974_v37  ;;  %v1284_v7 = vmov 1966171168  }
 0x42e   :  { %1226 = vpow2.f32 %v696_v8  ;;  %v941_v52 = vunpack.c.l.s4 %v1284_v7 }
 0x42f   :  { %1228 = vpow2.f32 %v700_v9  ;;  %v977_v2 = vrot.slane %v976_v43, 4 }
 0x430   :  { %1230 = vpow2.f32 %v698_v11 }
 0x431   :  { %1232 = vpow2.f32 %v702_v18 }
 0x437   :  { %v1219_v19 = vpop.eup %1218 }
 0x438   :  { %v1221_v25 = vpop.eup %1220  ;;  %733 = vrot.lane.b32.xlu0 %v1219_v19, %s1282_s7  ;;  %v918_v27 = vsel %vm632_vm3, %v1219_v19, 0.0 }
 0x439   :  { %v1223_v29 = vpop.eup %1222  ;;  %735 = vrot.lane.b32.xlu1 %v1221_v25, %s1282_s7  ;;  %v919_v30 = vsel %vm632_vm3, %v1221_v25, 0.0 }
 0x43a   :  { %v1225_v31 = vpop.eup %1224  ;;  %v920_v33 = vadd.f32 %v919_v30, %v918_v27  ;;  %v921_v35 = vsel %vm632_vm3, %v1223_v29, 0.0 }
 0x43b   :  { %v1227_v36 = vpop.eup %1226  ;;  %v923_v47 = vsel %vm632_vm3, %v1225_v31, 0.0 }
 0x43c   :  { %v922_v40 = vadd.f32 %v921_v35, %v920_v33  ;;  %v1229_v42 = vpop.eup %1228  ;;  %v925_v55 = vsel %vm632_vm3, %v1227_v36, 0.0 }
 0x43d   :  { %737 = vrot.lane.b32.xlu1 %v1223_v29, %s1282_s7  ;;  %745 = vrot.lane.b32.xlu0 %v1229_v42, %s1282_s7  ;;  %v1231_v50 = vpop.eup %1230  ;;  %v929_v61 = vsel %vm632_vm3, %v1229_v42, 0.0 }
 0x43e   :  { %v924_v49 = vadd.f32 %v923_v47, %v922_v40  ;;  %v927_v58 = vsel %vm632_vm3, %v1231_v50, 0.0  ;;  %v1233_v0 = vpop.eup %1232 }
 0x43f   :  { %v931_v1 = vsel %vm632_vm3, %v1233_v0, 0.0 }
 0x440   :  { %v926_v57 = vadd.f32 %v925_v55, %v924_v49 }
 0x441   :  { %739 = vrot.lane.b32.xlu1 %v1225_v31, %s1282_s7  ;;  %811 = vrot.lane.b32.xlu0 %v1516_v46, %s1283_s10  ;;  %v978_v46 = vadd.f32 %v977_v2, %v976_v43 }
 0x442   :  { %v928_v59 = vadd.f32 %v927_v58, %v926_v57 }
 0x444   :  { %v930_v44 = vadd.f32 %v929_v61, %v928_v59 }
 0x445   :  { %741 = vrot.lane.b32.xlu1 %v1227_v36, %s1282_s7  ;;  %807 = vrot.lane.b32.xlu0 %v1507_v38, %s1283_s10  ;;  %v661_v38 = vmul.f32 1.442695, %v660_v24 }
 0x446   :  { %v932_v3 = vadd.f32 %v931_v1, %v930_v44 }
 0x447   :  { %1234 = vpow2.f32 %v661_v38 }
 0x448   :  { %v933_v4 = vrot.slane %v932_v3, 4 }
 0x449   :  { %743 = vrot.lane.b32.xlu1 %v1231_v50, %s1282_s7  ;;  %803 = vrot.lane.b32.xlu0 %v1514_v45, %s1283_s10  ;;  %v979_v45 = vrot.slane %v978_v46, 2 }
 0x44a   :  { %v934_v5 = vadd.f32 %v933_v4, %v932_v3 }
 0x44b   :  { %v980_v8 = vadd.f32 %v979_v45, %v978_v46 }
 0x44c   :  { %v935_v53 = vrot.slane %v934_v5, 2 }
 0x44d   :  { %747 = vrot.lane.b32.xlu1 %v1233_v0, %s1282_s7  ;;  %799 = vrot.lane.b32.xlu0 %v1512_v41, %s1283_s10  ;;  %v942_v41 = vunpack.c.0.s8 %v941_v52  ;;  %v981_v21 = vrot.slane %v980_v8, 1 }
 0x44e   :  { %v936_v23 = vadd.f32 %v935_v53, %v934_v5 }
 0x44f   :  { %v982_v24 = vadd.f32 %v981_v21, %v980_v8 }
 0x450   :  { %v937_v9 = vrot.slane %v936_v23, 1 }
 0x451   :  { %809 = vrot.lane.b32.xlu1 %v1524_v51, %s1283_s10  ;;  %v1285_v51 = vmov 0.0  }
 0x452   :  { %36 = vst.msk [vmem:[#allocation4] sm:$0xff] %vm35_vm1, %v1285_v51  ;;  %v938_v11 = vadd.f32 %v937_v9, %v936_v23 }
 0x453   :  { %40 = vst.msk [vmem:[#allocation6] sm:$0x1] %vm39_vm6, %v1285_v51 }
 0x454   :  { %38 = vst.msk [vmem:[#allocation4 + $0x8] sm:$0x3] %vm37_vm7, %v1285_v51 }
 0x455   :  { %805 = vrot.lane.b32.xlu1 %v1509_v39, %s1283_s10  ;;  %v945_v39 = vsub.s32 %v942_v41, %v1556_v20  ;;  %42 = vst.msk [vmem:[#allocation2] sm:$0x1] %vm41_vm8, %v1285_v51 }
 0x457   :  { %v946_v13 = vrot.slane %v938_v11, %v945_v39 }
 0x459   :  { %801 = vrot.lane.b32.xlu1 %v1502_v32, %s1283_s10  ;;  %v1235_v32 = vpop.eup %1234  ;;  %v953_v14 = vrot.slane %v946_v13, %v945_v39 }
 0x45a   :  { %v718_v10 = vrot.slane %v1235_v32, %v1561_v6  ;;  %v908_v48 = vld [vmem:[#allocation6] sm:$0x1] }
 0x45c   :  { %v960_v40 = vld [vmem:[#allocation2] sm:$0x1] }
 0x45d   :  { %797 = vrot.lane.b32.xlu1 %v1498_v28, %s1283_s10  ;;  %v990_v28 = vrot.slane %v982_v24, %v945_v39 }
 0x45f   :  { %v997_v12 = vrot.slane %v990_v28, %v945_v39 }
 0x461   :  { %910 = vperm.xlu1 %1200, %v1235_v32  }
 0x465   :  { %720 = vperm.xlu1 %1200, %v718_v10  }
 0x469   :  { %998 = vrot.lane.b32.xlu1 %v997_v12, %s1283_s10 }
 0x46d   :  { %954 = vrot.lane.b32.xlu1 %v953_v14, %s1282_s7 }
 0x4aa   :  { %v734_v20 = vpop.permute.xlu0 %733 }
 0x4ab   :  { %v736_v15 = vpop.permute.xlu1 %735  ;;  %757 = vxpose.xlu0.b32.start [1/8] (short) (narrow) %v734_v20, 16 }
 0x4af   :  { %v738_v63 = vpop.permute.xlu1 %737  ;;  %758 = vxpose.xlu0.b32.cont [2/8] (short) (narrow) %v736_v15, 16  ;;  %v746_v16 = vpop.permute.xlu0 %745 }
 0x4b3   :  { %v740_v17 = vpop.permute.xlu1 %739  ;;  %759 = vxpose.xlu0.b32.cont [3/8] (short) (narrow) %v738_v63, 16  ;;  %v812_v18 = vpop.permute.xlu0 %811 }
 0x4b4   :  { %1169 = vmatprep.subr.mxu0 %v812_v18 }
 0x4b5   :  { %1170 = vmatpush3.msra.mxu0 %v812_v18 }
 0x4b7   :  { %v742_v19 = vpop.permute.xlu1 %741  ;;  %760 = vxpose.xlu0.b32.cont [4/8] (short) (narrow) %v740_v17, 16  ;;  %v808_v26 = vpop.permute.xlu0 %807 }
 0x4bb   :  { %v744_v22 = vpop.permute.xlu1 %743  ;;  %761 = vxpose.xlu0.b32.cont [5/8] (short) (narrow) %v742_v19, 16  ;;  %v804_v29 = vpop.permute.xlu0 %803 }
 0x4bf   :  { %v748_v25 = vpop.permute.xlu1 %747  ;;  %762 = vxpose.xlu0.b32.cont [6/8] (short) (narrow) %v744_v22, 16  ;;  %v800_v33 = vpop.permute.xlu0 %799 }
 0x4c3   :  { %v810_v27 = vpop.permute.xlu1 %809  ;;  %763 = vxpose.xlu0.b32.cont [7/8] (short) (narrow) %v746_v16, 16 }
 0x4c4   :  { %1171 = vmatprep.subr.mxu0 %v810_v27 }
 0x4c5   :  { %1172 = vmatpush3.msra.mxu0 %v810_v27 }
 0x4c6   :  { %1173 = vmatprep.subr.mxu0 %v808_v26 }
 0x4c7   :  { %v806_v30 = vpop.permute.xlu1 %805  ;;  %1174 = vmatpush3.msra.mxu0 %v808_v26  ;;  %764 = vxpose.xlu0.b32.end [8/8] (short) (narrow) %v748_v25, 16 }
 0x4c8   :  { %1175 = vmatprep.subr.mxu0 %v806_v30 }
 0x4c9   :  { %1176 = vmatpush3.msra.mxu0 %v806_v30 }
 0x4ca   :  { %1177 = vmatprep.subr.mxu0 %v804_v29 }
 0x4cb   :  { %v802_v31 = vpop.permute.xlu1 %801  ;;  %1178 = vmatpush3.msra.mxu0 %v804_v29 }
 0x4cc   :  { %1179 = vmatprep.subr.mxu0 %v802_v31 }
 0x4cd   :  { %1180 = vmatpush3.msra.mxu0 %v802_v31 }
 0x4ce   :  { %1181 = vmatprep.subr.mxu0 %v800_v33 }
 0x4cf   :  { %v798_v34 = vpop.permute.xlu1 %797  ;;  %1182 = vmatpush3.msra.mxu0 %v800_v33 }
 0x4d0   :  { %1183 = vmatprep.subr.mxu0 %v798_v34 }
 0x4d1   :  { %1184 = vmatpush3.msra.mxu0 %v798_v34 }
 0x4dc   :  { %v911_v35 = vpop.permute.xlu1 %910 }
 0x4dd   :  { %v916_v42 = vrot.slane %v911_v35, %v1561_v6 }
 0x4df   :  { %v917_v50 = vmul.f32 %v916_v42, %v908_v48 }
 0x4e0   :  { %v721_v36 = vpop.permute.xlu1 %720 }
 0x4e4   :  { %v999_v47 = vpop.permute.xlu1 %998 }
 0x4e5   :  { %v1001_v49 = vadd.f32 %v999_v47, %v960_v40 }
 0x4e7   :  { %1003 = vst.msk [vmem:[#allocation2] sm:$0x1] %vm41_vm8, %v1001_v49 }
 0x4e8   :  { %v955_v54 = vpop.permute.xlu1 %954 }
 0x4e9   :  { %v957_v55 = vadd.f32 %v955_v54, %v917_v50 }
 0x4eb   :  { %959 = vst.msk [vmem:[#allocation6] sm:$0x1] %vm39_vm6, %v957_v55 }
 0x4f0   :  { %1201 = vset.pattern.permute.xlu0 %v1281_v62 }
 0x4f2   :  { %v1025_v56 = vld [vmem:[#allocation6] sm:$0x1] }
 0x4f3   :  { %v1026_v57 = vadd.f32 6.4e-05, %v1025_v56 }
 0x4f5   :  { %v1027_v58 = vmul.f32 0.31622776, %v1026_v57 }
 0x4f7   :  { %1028 = vst.msk [vmem:[#allocation6] sm:$0x1] %vm39_vm6, %v1027_v58 }
 0x527   :  { %v773_v37 = vpop.trf.xlu0 }
 0x528   :  { %1185 = vmatprep.mubr.msk.f32.mxu0 %vm821_vm9, %v773_v37 }
 0x52b   :  { %v774_v59 = vpop.trf.xlu0 }
 0x52c   :  { %1186 = vmatmul.mubr.msk.f32.vlgmr.msra.gmra.mxu0 %vm821_vm9, %v774_v59 }
 0x52d   :  { %1247 = shalt.err (!%p1244_p4)
}
 0x52e   :  { %1052 = dma.vmem_to_hbm [thread:$0]  %s1050_s12, 16, %s1664_s9, [#allocation7]   ;;  %v713_v62 = vld [vmem:[#allocation4 + $0x8] sm:$0x3]  ;;  %v712_v60 = vld [vmem:[#allocation4] sm:$0xff] }
 0x52f   :  { %v724_v61 = vmul.f32 %v721_v36, %v713_v62  ;;  %v723_v43 = vmul.f32 %v721_v36, %v712_v60  ;;  %v1011_v2 = vld [vmem:[#allocation2] sm:$0x1]  ;;  %s1287_s9 = smov [#allocation4]  }
 0x530   :  { %v1012_v38 = vmul.f32 1e-06, %v1011_v2  ;;  %s1036_s16 = sshll.u32 %s1287_s9, 4  ;;  %s1037_s16 = int_to_ptr.vmem [resolvable:$true] %s1036_s16 }
 0x531   :  { %s1256_s17 = scalar_lea.vmem %s1037_s16, 256  ;;  %p1261_p6 = scmp.lt.s32.totalorder %s1037_s16, %s1037_s16 }
 0x532   :  { %v1017_v46 = vrot.slane %v1012_v38, %v1561_v6  ;;  %p1257_p5 = scmp.ne.s32.totalorder %s1037_s16, %s1256_s17  ;;  %p1262_p7 = scmp.lt.s32.totalorder %s1256_s17, %s1256_s17 }
 0x534   :  { %p1263_p8 = por %p1262_p7, %p1261_p6 }
 0x536   :  { %p1264_p9 = pnand %p1263_p8, %p1257_p5 }
 0x5ec   :  { %v1187_v0 = vpop.f32.mrf.mxu0 }
 0x5ed   :  { %v904_v44 = vadd.f32 %v1187_v0, %v724_v61 }
 0x5ee   :  { %v894_v1 = vpop.f32.mrf.mxu0 }
 0x5ef   :  { %907 = vst.msk [vmem:[#allocation4 + $0x8] sm:$0x3] %vm37_vm7, %v904_v44  ;;  %v903_v3 = vadd.f32 %v894_v1, %v723_v43 }
 0x5f1   :  { %905 = vst.msk [vmem:[#allocation4] sm:$0xff] %vm35_vm1, %v903_v3 }
 0x5f6   :  { %v1010_v4 = vld [vmem:[#allocation4 + $0x8] sm:$0x3] }
 0x5f7   :  { %v1020_v45 = vadd.f32 %v1017_v46, %v1010_v4 }
 0x5f8   :  { %v1009_v5 = vld [vmem:[#allocation4] sm:$0xff] }
 0x5f9   :  { %v1019_v7 = vadd.f32 %v1017_v46, %v1009_v5  ;;  %v1022_v52 = vmul.f32 0.31622776, %v1020_v45 }
 0x5fb   :  { %v1021_v8 = vmul.f32 0.31622776, %v1019_v7  ;;  %1024 = vst.msk [vmem:[#allocation4 + $0x8] sm:$0x3] %vm37_vm7, %v1022_v52 }
 0x5fd   :  { %1023 = vst.msk [vmem:[#allocation4] sm:$0xff] %vm35_vm1, %v1021_v8 }
 0x5fe   :  { %1267 = shalt.err (!%p1264_p9)
}
 0x5ff   :  { %s1288_s3 = smov 128   ;;  %s1289_s4 = smov 8  }
 0x600   :  { %1042 = dma.vmem_to_hbm [thread:$0]  %s1037_s16, 256, %s1663_s8, [#allocation5], %s1288_s3, %s1288_s3, %s1289_s4  }
 0x601   :  { %1276 = dma.done.wait [#allocation5], 256  }
 0x602   :  { %1277 = vsyncadd [#allocation5], 4294967040 }
 0x603   :  { %1278 = dma.done.wait [#allocation7], 16  }
 0x604   :  { %1279 = vsyncadd [#allocation7], 4294967280 }
 0x605   :  { %1061 = vsyncpa [#allocation5], 1 }
 0x606   :  { %1062 = vsyncpa [#allocation7], 1 }

</bundles_post_ra>
